<compile_context>
chip_gen: v5e
topology: v5e:2x2
jax: 0.10.0
libtpu: 0.0.40
codegen_flags: <defaults>
</compile_context>

<pallas_src>
import math
import functools

import jax
import jax.numpy as jnp
from jax.experimental import pallas as pl
from jax.experimental.pallas import tpu as pltpu


# ----------------------------- kernel helpers -------------------------------

def _layer_norm(x, gamma, beta, eps=1e-5):
    mu = jnp.mean(x, axis=-1, keepdims=True)
    var = jnp.mean(jnp.square(x - mu), axis=-1, keepdims=True)
    return (x - mu) * jax.lax.rsqrt(var + eps) * gamma + beta


# ------------------------------- fused kernel -------------------------------

def encoder_cls_kernel(n_heads,
                       x_ref, pe_ref,
                       wqkv_ref, wo_ref, w1_ref, w2_ref, side_ref,
                       wd_ref, bd_ref,
                       out_ref,
                       h_ref):
    """grid = (batch_blocks, layers).  h_ref: resident f32 activation [Bb*S, E]."""
    l = pl.program_id(1)
    n_layers = pl.num_programs(1)

    Bb, S, E = x_ref.shape
    M = Bb * S
    H = n_heads
    Dh = E // H
    G = H * Bb
    F = w1_ref.shape[-1]
    scale = 1.0 / math.sqrt(Dh)

    # ---- layer 0: fuse the positional-encoding add, init resident scratch --
    @pl.when(l == 0)
    def _init():
        h_ref[...] = (x_ref[...] + pe_ref[...]).reshape(M, E)

    x = h_ref[...]                                   # [M, E] float32
    xb = x.astype(jnp.bfloat16)

    # ---- per-layer packed side vectors (one DMA stream) ---------------------
    side = side_ref[0]                               # [8, P] float32
    bqkv = side[0:1, :3 * Dh]
    bo = side[1:2, :E]
    g1 = side[2:3, :E]
    b1 = side[3:4, :E]
    bf1 = side[4:5, :F]
    bf2 = side[5:6, :E]
    g2 = side[6:7, :E]
    b2 = side[7:8, :E]

    # ---- fused q/k/v projection (shared per-head Linear(Dh, Dh)) -----------
    # Rows ordered (head, batch, seq) so one [Dh, 3*Dh] weight serves every
    # head and the matmul M-dimension is H * Bb * S.
    xhm = jnp.concatenate([xb[:, h * Dh:(h + 1) * Dh] for h in range(H)],
                          axis=0)                                    # [H*M, Dh]
    qkv = (jnp.dot(xhm, wqkv_ref[0], preferred_element_type=jnp.float32)
           + bqkv)                                                   # [H*M, 3Dh]

    # 1/sqrt(Dh) folded into q while casting to bf16.
    q = (qkv[:, 0 * Dh:1 * Dh] * scale).astype(jnp.bfloat16).reshape(G, S, Dh)
    k = qkv[:, 1 * Dh:2 * Dh].astype(jnp.bfloat16).reshape(G, S, Dh)
    v = qkv[:, 2 * Dh:3 * Dh].astype(jnp.bfloat16).reshape(G, S, Dh)

    # ---- batched attention over g = (head, batch) ---------------------------
    s = jnp.einsum('gid,gjd->gij', q, k,
                   preferred_element_type=jnp.float32)               # [G, S, S]
    s = s - jnp.max(s, axis=-1, keepdims=True)
    p = jnp.exp(s)
    p = p * pl.reciprocal(jnp.sum(p, axis=-1, keepdims=True), approx=True)
    o = jnp.einsum('gij,gjd->gid', p.astype(jnp.bfloat16), v,
                   preferred_element_type=jnp.float32)               # [G, S, Dh]
    o = o.reshape(H, M, Dh)
    concat = jnp.concatenate([o[h] for h in range(H)], axis=-1)      # [M, E]

    attn = (jnp.dot(concat.astype(jnp.bfloat16), wo_ref[0],
                    preferred_element_type=jnp.float32) + bo)

    # ---- residual + LayerNorm 1 (f32) ---------------------------------------
    h1 = _layer_norm(attn + x, g1, b1)

    # ---- feed-forward network -----------------------------------------------
    f = jnp.dot(h1.astype(jnp.bfloat16), w1_ref[0],
                preferred_element_type=jnp.float32) + bf1
    f = jnp.maximum(f, 0.0)
    f = jnp.dot(f.astype(jnp.bfloat16), w2_ref[0],
                preferred_element_type=jnp.float32) + bf2

    # ---- residual + LayerNorm 2, keep resident ------------------------------
    h2 = _layer_norm(f + h1, g2, b2)
    h_ref[...] = h2

    # ---- last layer: per-sequence max-pool + classifier (lane-padded) ------
    @pl.when(l == n_layers - 1)
    def _finalize():
        pooled = jnp.max(h2.reshape(Bb, S, E), axis=1)               # [Bb, E]
        logits = (jnp.dot(pooled.astype(jnp.bfloat16), wd_ref[...],
                          preferred_element_type=jnp.float32) + bd_ref[...])
        out_ref[...] = logits[None]                                  # [1, Bb, Cp]


# ------------------------------ parameters ----------------------------------

def init_params(key, *, vocab, E, H, S, layers, expansion, classes, c_pad=128):
    assert E % H == 0, "embed_dim must be divisible by n_heads"
    Dh = E // H
    F = expansion * E
    P = max(128, F, E, 3 * Dh)
    P = ((P + 127) // 128) * 128
    k = key

    def nxt():
        nonlocal k
        k, sub = jax.random.split(k)
        return sub

    params = {}
    params['embed'] = jax.random.normal(nxt(), (vocab, E), jnp.float32) * 0.1

    # sinusoidal positional encoding (same recipe as the PyTorch buffer)
    pos = jnp.arange(S, dtype=jnp.float32)[:, None]
    div = jnp.exp(jnp.arange(0, E, 2, dtype=jnp.float32)
                  * (-math.log(10000.0) / E))
    pe = jnp.zeros((S, E), jnp.float32)
    pe = pe.at[:, 0::2].set(jnp.sin(pos * div))
    pe = pe.at[:, 1::2].set(jnp.cos(pos * div))
    params['pe'] = pe[None]                                    # [1, S, E]

    def linear(out_f, in_f):
        bound = 1.0 / math.sqrt(in_f)
        w = jax.random.uniform(nxt(), (out_f, in_f), jnp.float32, -bound, bound)
        b = jax.random.uniform(nxt(), (out_f,), jnp.float32, -bound, bound)
        return w, b

    wqkv_l, wo_l, w1_l, w2_l, side_l = [], [], [], [], []
    for _ in range(layers):
        wq, bq = linear(Dh, Dh)
        wk, bk = linear(Dh, Dh)
        wv, bv = linear(Dh, Dh)
        wo, bo = linear(E, E)
        w1, bf1 = linear(F, E)
        w2, bf2 = linear(E, F)

        wqkv_l.append(jnp.concatenate([wq.T, wk.T, wv.T], axis=1))  # [Dh, 3Dh]
        wo_l.append(wo.T)
        w1_l.append(w1.T)
        w2_l.append(w2.T)

        # pack all tiny per-layer vectors into one [8, P] block
        side = jnp.zeros((8, P), jnp.float32)
        side = side.at[0, :3 * Dh].set(jnp.concatenate([bq, bk, bv]))
        side = side.at[1, :E].set(bo)
        side = side.at[2, :E].set(jnp.ones((E,), jnp.float32))     # LN1 gamma
        side = side.at[3, :E].set(jnp.zeros((E,), jnp.float32))    # LN1 beta
        side = side.at[4, :F].set(bf1)
        side = side.at[5, :E].set(bf2)
        side = side.at[6, :E].set(jnp.ones((E,), jnp.float32))     # LN2 gamma
        side = side.at[7, :E].set(jnp.zeros((E,), jnp.float32))    # LN2 beta
        side_l.append(side)

    # stacked per-layer weights; matmul weights in bf16 (f32 accumulation)
    params['wqkv'] = jnp.stack(wqkv_l).astype(jnp.bfloat16)    # [L, Dh, 3Dh]
    params['wo'] = jnp.stack(wo_l).astype(jnp.bfloat16)        # [L, E, E]
    params['w1'] = jnp.stack(w1_l).astype(jnp.bfloat16)        # [L, E, F]
    params['w2'] = jnp.stack(w2_l).astype(jnp.bfloat16)        # [L, F, E]
    params['side'] = jnp.stack(side_l)                         # [L, 8, P] f32

    # classifier, lane-padded to c_pad for dense vector stores
    wd, bd = linear(classes, E)
    wd_pad = jnp.zeros((E, c_pad), jnp.float32).at[:, :classes].set(wd.T)
    bd_pad = jnp.zeros((1, c_pad), jnp.float32).at[:, :classes].set(bd[None, :])
    params['wd'] = wd_pad.astype(jnp.bfloat16)                 # [E, C_pad]
    params['bd'] = bd_pad                                      # [1, C_pad]
    return params


# --------------------------- VMEM budget helper ------------------------------

def _vmem_limit_bytes(Bb, S, E, F, Dh, P, c_pad, H):
    """Scoped VMEM limit derived from actual buffer sizes (v7x: 64 MiB/TC)."""
    f32, bf16 = 4, 2
    M = Bb * S
    per_step = (bf16 * (Dh * 3 * Dh + E * E + 2 * E * F)   # layer matmul weights
                + f32 * 8 * P                              # packed side vectors
                + f32 * M * E + f32 * S * E                # x block + pe block
                + bf16 * E * c_pad + f32 * c_pad           # classifier weights
                + f32 * Bb * c_pad)                        # output block
    scratch = f32 * M * E                                  # resident activation
    inter = f32 * (H * M * 3 * Dh                          # qkv
                   + 2 * H * Bb * S * S                    # scores + probs
                   + M * (2 * E + F))                      # ffn / residual temps
    est = 2 * per_step + scratch + 2 * inter               # double-buffer + slack
    return int(min(max(4 * est, 16 * 2 ** 20), 48 * 2 ** 20))


# ------------------------------- forward ------------------------------------

def transformer_forward(params, src, *, n_heads, n_layers, n_classes,
                        batch_block=None):
    # Embedding lookup (data-dependent gather) stays in plain JAX glue.
    x = jnp.take(params['embed'], src, axis=0)                  # [B, S, E]
    B, S, E = x.shape
    Dh = E // n_heads
    F = params['w1'].shape[-1]
    C_pad = params['wd'].shape[-1]
    P = params['side'].shape[-1]

    Bb = B if batch_block is None else batch_block
    assert B % Bb == 0, "batch must be divisible by batch_block"
    nb = B // Bb

    def wmap(b, l):                       # per-layer stacked weights
        return (l, 0, 0)

    flops_layer = (2 * n_heads * B * S * Dh * 3 * Dh           # qkv proj
                   + 4 * B * n_heads * S * S * Dh              # scores + pv
                   + 2 * B * S * E * E                         # out proj
                   + 4 * B * S * E * F)                        # ffn
    cost = pl.CostEstimate(
        flops=int(n_layers * flops_layer + 2 * B * E * C_pad),
        transcendentals=int(n_layers * B * n_heads * S * S),
        bytes_accessed=int(
            nb * n_layers * (2 * (Dh * 3 * Dh + E * E + 2 * E * F) + 4 * 8 * P)
            + 4 * B * S * E + 4 * S * E
            + 2 * E * C_pad + 4 * C_pad + 4 * B * C_pad))

    logits_pad = pl.pallas_call(
        functools.partial(encoder_cls_kernel, n_heads),
        out_shape=jax.ShapeDtypeStruct((nb, Bb, C_pad), jnp.float32),
        grid_spec=pltpu.PrefetchScalarGridSpec(
            num_scalar_prefetch=0,
            grid=(nb, n_layers),
            in_specs=[
                pl.BlockSpec((Bb, S, E), lambda b, l: (b, 0, 0)),   # embeddings
                pl.BlockSpec((1, S, E), lambda b, l: (0, 0, 0)),    # pos. enc.
                pl.BlockSpec((1, Dh, 3 * Dh), wmap),                # wqkv
                pl.BlockSpec((1, E, E), wmap),                      # wo
                pl.BlockSpec((1, E, F), wmap),                      # w1
                pl.BlockSpec((1, F, E), wmap),                      # w2
                pl.BlockSpec((1, 8, P), wmap),                      # packed side
                pl.BlockSpec((E, C_pad), lambda b, l: (0, 0)),      # classifier w
                pl.BlockSpec((1, C_pad), lambda b, l: (0, 0)),      # classifier b
            ],
            out_specs=pl.BlockSpec((1, Bb, C_pad), lambda b, l: (b, 0, 0)),
            scratch_shapes=[pltpu.VMEM((Bb * S, E), jnp.float32)],  # resident act.
        ),
        compiler_params=pltpu.CompilerParams(
            # batch-block axis shards across the 2 TensorCores on v7x when
            # nb >= 2; layer axis keeps the activation resident in VMEM.
            dimension_semantics=("parallel", "arbitrary"),
            vmem_limit_bytes=_vmem_limit_bytes(Bb, S, E, F, Dh, P, C_pad,
                                               n_heads)),
        cost_estimate=cost,
    )(x, params['pe'],
      params['wqkv'], params['wo'], params['w1'], params['w2'], params['side'],
      params['wd'], params['bd'])

    return logits_pad.reshape(nb * Bb, C_pad)[:B, :n_classes]   # [B, C]


# --------------------------------- main --------------------------------------

if __name__ == "__main__":
    B, S, E, H = 2, 8, 32, 4          # batch, seq_len, embed_dim, heads
    LAYERS, EXPANSION = 2, 4
    VOCAB, CLASSES = 50, 5

    key = jax.random.PRNGKey(0)
    pkey, dkey = jax.random.split(key)
    params = init_params(pkey, vocab=VOCAB, E=E, H=H, S=S,
                         layers=LAYERS, expansion=EXPANSION, classes=CLASSES)
    src = jax.random.randint(dkey, (B, S), 0, VOCAB, dtype=jnp.int32)

    out = transformer_forward(params, src, n_heads=H, n_layers=LAYERS,
                              n_classes=CLASSES)                # [B, CLASSES]
    jax.block_until_ready(out)
    assert out.shape == (B, CLASSES)
    assert bool(jnp.all(jnp.isfinite(out)))
    print("KERNEL_OK")
</pallas_src>

<mosaic_0001>
module attributes {stable_mosaic.version = 11 : i64} {
  func.func @encoder_cls_kernel(%arg0: i32, %arg1: i32, %arg2: memref<2x8x32xf32, #tpu.memory_space<vmem>>, %arg3: memref<1x8x32xf32, #tpu.memory_space<vmem>>, %arg4: memref<1x8x24xbf16, #tpu.memory_space<vmem>>, %arg5: memref<1x32x32xbf16, #tpu.memory_space<vmem>>, %arg6: memref<1x32x128xbf16, #tpu.memory_space<vmem>>, %arg7: memref<1x128x32xbf16, #tpu.memory_space<vmem>>, %arg8: memref<1x8x128xf32, #tpu.memory_space<vmem>>, %arg9: memref<32x128xbf16, #tpu.memory_space<vmem>>, %arg10: memref<1x128xf32, #tpu.memory_space<vmem>>, %arg11: memref<1x2x128xf32, #tpu.memory_space<vmem>>, %arg12: memref<16x32xf32, #tpu.memory_space<vmem>>) attributes {dimension_semantics = [#tpu.dimension_semantics<parallel>, #tpu.dimension_semantics<arbitrary>], iteration_bounds = array<i64: 1, 2>, scalar_prefetch = 0 : i64, scratch_operands = 1 : i64, tpu.core_type = #tpu.core_type<tc>, window_params = [{transform_indices = @transform_0, window_bounds = array<i64: 2, 8, 32>}, {pipeline_mode = #tpu.pipeline_mode<synchronous>, transform_indices = @transform_1, window_bounds = array<i64: 1, 8, 32>}, {transform_indices = @transform_2, window_bounds = array<i64: 1, 8, 24>}, {transform_indices = @transform_3, window_bounds = array<i64: 1, 32, 32>}, {transform_indices = @transform_4, window_bounds = array<i64: 1, 32, 128>}, {transform_indices = @transform_5, window_bounds = array<i64: 1, 128, 32>}, {transform_indices = @transform_6, window_bounds = array<i64: 1, 8, 128>}, {pipeline_mode = #tpu.pipeline_mode<synchronous>, transform_indices = @transform_7, window_bounds = array<i64: 32, 128>}, {pipeline_mode = #tpu.pipeline_mode<synchronous>, transform_indices = @transform_8, window_bounds = array<i64: 1, 128>}, {transform_indices = @transform_9, window_bounds = array<i64: 1, 2, 128>}]} {
    %c0_i32 = arith.constant 0 : i32
    %0 = arith.cmpi eq, %arg1, %c0_i32 : i32
    %1 = arith.extui %0 : i1 to i32
    %c0_i32_0 = arith.constant 0 : i32
    %2 = arith.cmpi ne, %1, %c0_i32_0 : i32
    scf.if %2 {
      %c0_39 = arith.constant 0 : index
      %c0_40 = arith.constant 0 : index
      %c0_41 = arith.constant 0 : index
      %129 = vector.load %arg2[%c0_39, %c0_40, %c0_41] : memref<2x8x32xf32, #tpu.memory_space<vmem>>, vector<2x8x32xf32>
      %c0_42 = arith.constant 0 : index
      %c0_43 = arith.constant 0 : index
      %c0_44 = arith.constant 0 : index
      %130 = vector.load %arg3[%c0_42, %c0_43, %c0_44] : memref<1x8x32xf32, #tpu.memory_space<vmem>>, vector<1x8x32xf32>
      %131 = vector.broadcast %130 : vector<1x8x32xf32> to vector<2x8x32xf32>
      %132 = arith.addf %129, %131 : vector<2x8x32xf32>
      %133 = vector.shape_cast %132 : vector<2x8x32xf32> to vector<16x32xf32>
      %c0_45 = arith.constant 0 : index
      %c0_46 = arith.constant 0 : index
      %134 = vector.load %arg12[%c0_45, %c0_46] : memref<16x32xf32, #tpu.memory_space<vmem>>, vector<16x32xf32>
      tpu.vector_store %arg12[%c0_45, %c0_46], %133 {strides = array<i32>} : memref<16x32xf32, #tpu.memory_space<vmem>>, vector<16x32xf32>,
    } else {
    }
    %c0 = arith.constant 0 : index
    %c0_1 = arith.constant 0 : index
    %3 = vector.load %arg12[%c0, %c0_1] : memref<16x32xf32, #tpu.memory_space<vmem>>, vector<16x32xf32>
    %4 = arith.truncf %3 : vector<16x32xf32> to vector<16x32xbf16>
    %c0_2 = arith.constant 0 : index
    %c0_3 = arith.constant 0 : index
    %c0_4 = arith.constant 0 : index
    %5 = vector.load %arg8[%c0_2, %c0_3, %c0_4] : memref<1x8x128xf32, #tpu.memory_space<vmem>>, vector<1x8x128xf32>
    %6 = vector.shape_cast %5 : vector<1x8x128xf32> to vector<8x128xf32>
    %7 = vector.extract_strided_slice %6 {offsets = [0, 0], sizes = [1, 24], strides = [1, 1]} : vector<8x128xf32> to vector<1x24xf32>
    %8 = vector.extract_strided_slice %6 {offsets = [1, 0], sizes = [1, 32], strides = [1, 1]} : vector<8x128xf32> to vector<1x32xf32>
    %9 = vector.extract_strided_slice %6 {offsets = [2, 0], sizes = [1, 32], strides = [1, 1]} : vector<8x128xf32> to vector<1x32xf32>
    %10 = vector.extract_strided_slice %6 {offsets = [3, 0], sizes = [1, 32], strides = [1, 1]} : vector<8x128xf32> to vector<1x32xf32>
    %11 = vector.extract_strided_slice %6 {offsets = [4, 0], sizes = [1, 128], strides = [1, 1]} : vector<8x128xf32> to vector<1x128xf32>
    %12 = vector.extract_strided_slice %6 {offsets = [5, 0], sizes = [1, 32], strides = [1, 1]} : vector<8x128xf32> to vector<1x32xf32>
    %13 = vector.extract_strided_slice %6 {offsets = [6, 0], sizes = [1, 32], strides = [1, 1]} : vector<8x128xf32> to vector<1x32xf32>
    %14 = vector.extract_strided_slice %6 {offsets = [7, 0], sizes = [1, 32], strides = [1, 1]} : vector<8x128xf32> to vector<1x32xf32>
    %15 = vector.extract_strided_slice %4 {offsets = [0, 0], sizes = [16, 8], strides = [1, 1]} : vector<16x32xbf16> to vector<16x8xbf16>
    %16 = vector.extract_strided_slice %4 {offsets = [0, 8], sizes = [16, 8], strides = [1, 1]} : vector<16x32xbf16> to vector<16x8xbf16>
    %17 = vector.extract_strided_slice %4 {offsets = [0, 16], sizes = [16, 8], strides = [1, 1]} : vector<16x32xbf16> to vector<16x8xbf16>
    %18 = vector.extract_strided_slice %4 {offsets = [0, 24], sizes = [16, 8], strides = [1, 1]} : vector<16x32xbf16> to vector<16x8xbf16>
    %19 = tpu.concatenate %15, %16, %17, %18 in 0 : vector<16x8xbf16>, vector<16x8xbf16>, vector<16x8xbf16>, vector<16x8xbf16> -> vector<64x8xbf16>
    %c0_5 = arith.constant 0 : index
    %c0_6 = arith.constant 0 : index
    %c0_7 = arith.constant 0 : index
    %20 = vector.load %arg4[%c0_5, %c0_6, %c0_7] : memref<1x8x24xbf16, #tpu.memory_space<vmem>>, vector<1x8x24xbf16>
    %21 = vector.shape_cast %20 : vector<1x8x24xbf16> to vector<8x24xbf16>
    %cst = arith.constant dense<0.000000e+00> : vector<64x24xf32>
    %22 = tpu.matmul %19, %21, %cst {dimension_numbers = #tpu.dot_dimension_numbers<[1], [0], [0], [1], [0, 0, 1, 1], [], []>} : vector<64x8xbf16>, vector<8x24xbf16>, vector<64x24xf32> -> vector<64x24xf32>
    %23 = vector.broadcast %7 : vector<1x24xf32> to vector<64x24xf32>
    %24 = arith.addf %22, %23 : vector<64x24xf32>
    %25 = vector.extract_strided_slice %24 {offsets = [0, 0], sizes = [64, 8], strides = [1, 1]} : vector<64x24xf32> to vector<64x8xf32>
    %cst_8 = arith.constant 0.353553385 : f32
    %26 = vector.broadcast %cst_8 : f32 to vector<64x8xf32>
    %27 = arith.mulf %25, %26 : vector<64x8xf32>
    %28 = arith.truncf %27 : vector<64x8xf32> to vector<64x8xbf16>
    %29 = vector.shape_cast %28 : vector<64x8xbf16> to vector<8x8x8xbf16>
    %30 = vector.extract_strided_slice %24 {offsets = [0, 8], sizes = [64, 8], strides = [1, 1]} : vector<64x24xf32> to vector<64x8xf32>
    %31 = arith.truncf %30 : vector<64x8xf32> to vector<64x8xbf16>
    %32 = vector.shape_cast %31 : vector<64x8xbf16> to vector<8x8x8xbf16>
    %33 = vector.extract_strided_slice %24 {offsets = [0, 16], sizes = [64, 8], strides = [1, 1]} : vector<64x24xf32> to vector<64x8xf32>
    %34 = arith.truncf %33 : vector<64x8xf32> to vector<64x8xbf16>
    %35 = vector.shape_cast %34 : vector<64x8xbf16> to vector<8x8x8xbf16>
    "tpu.trace_start"() <{level = 10 : i32, message = "gid,gjd->gij"}> : () -> ()
    %cst_9 = arith.constant dense<0.000000e+00> : vector<8x8x8xf32>
    %36 = tpu.matmul %29, %32, %cst_9 {dimension_numbers = #tpu.dot_dimension_numbers<[2], [2], [1], [1], [0, 0, 0, 1, 1, 1], [0], [0]>} : vector<8x8x8xbf16>, vector<8x8x8xbf16>, vector<8x8x8xf32> -> vector<8x8x8xf32>
    "tpu.trace_stop"() : () -> ()
    %cst_10 = arith.constant dense<0xFF800000> : vector<8x8xf32>
    %37 = vector.multi_reduction <maximumf>, %36, %cst_10 [2] : vector<8x8x8xf32> to vector<8x8xf32>
    %38 = vector.shape_cast %37 : vector<8x8xf32> to vector<8x8x1xf32>
    %39 = vector.broadcast %38 : vector<8x8x1xf32> to vector<8x8x8xf32>
    %40 = arith.subf %36, %39 : vector<8x8x8xf32>
    %41 = math.exp %40 : vector<8x8x8xf32>
    %cst_11 = arith.constant dense<0.000000e+00> : vector<8x8xf32>
    %42 = vector.multi_reduction <add>, %41, %cst_11 [2] : vector<8x8x8xf32> to vector<8x8xf32>
    %43 = vector.shape_cast %42 : vector<8x8xf32> to vector<8x8x1xf32>
    %44 = tpu.reciprocal %43 {approx = true} : vector<8x8x1xf32> -> vector<8x8x1xf32>
    %45 = vector.broadcast %44 : vector<8x8x1xf32> to vector<8x8x8xf32>
    %46 = arith.mulf %41, %45 : vector<8x8x8xf32>
    %47 = arith.truncf %46 : vector<8x8x8xf32> to vector<8x8x8xbf16>
    "tpu.trace_start"() <{level = 10 : i32, message = "gij,gjd->gid"}> : () -> ()
    %cst_12 = arith.constant dense<0.000000e+00> : vector<8x8x8xf32>
    %48 = tpu.matmul %47, %35, %cst_12 {dimension_numbers = #tpu.dot_dimension_numbers<[2], [1], [1], [2], [0, 0, 0, 1, 1, 2], [0], [0]>} : vector<8x8x8xbf16>, vector<8x8x8xbf16>, vector<8x8x8xf32> -> vector<8x8x8xf32>
    "tpu.trace_stop"() : () -> ()
    %49 = vector.shape_cast %48 : vector<8x8x8xf32> to vector<4x16x8xf32>
    %50 = vector.extract_strided_slice %49 {offsets = [0, 0, 0], sizes = [1, 16, 8], strides = [1, 1, 1]} : vector<4x16x8xf32> to vector<1x16x8xf32>
    %51 = vector.shape_cast %50 : vector<1x16x8xf32> to vector<16x8xf32>
    %52 = vector.extract_strided_slice %49 {offsets = [1, 0, 0], sizes = [1, 16, 8], strides = [1, 1, 1]} : vector<4x16x8xf32> to vector<1x16x8xf32>
    %53 = vector.shape_cast %52 : vector<1x16x8xf32> to vector<16x8xf32>
    %54 = vector.extract_strided_slice %49 {offsets = [2, 0, 0], sizes = [1, 16, 8], strides = [1, 1, 1]} : vector<4x16x8xf32> to vector<1x16x8xf32>
    %55 = vector.shape_cast %54 : vector<1x16x8xf32> to vector<16x8xf32>
    %56 = vector.extract_strided_slice %49 {offsets = [3, 0, 0], sizes = [1, 16, 8], strides = [1, 1, 1]} : vector<4x16x8xf32> to vector<1x16x8xf32>
    %57 = vector.shape_cast %56 : vector<1x16x8xf32> to vector<16x8xf32>
    %58 = tpu.concatenate %51, %53, %55, %57 in 1 : vector<16x8xf32>, vector<16x8xf32>, vector<16x8xf32>, vector<16x8xf32> -> vector<16x32xf32>
    %59 = arith.truncf %58 : vector<16x32xf32> to vector<16x32xbf16>
    %c0_13 = arith.constant 0 : index
    %c0_14 = arith.constant 0 : index
    %c0_15 = arith.constant 0 : index
    %60 = vector.load %arg5[%c0_13, %c0_14, %c0_15] : memref<1x32x32xbf16, #tpu.memory_space<vmem>>, vector<1x32x32xbf16>
    %61 = vector.shape_cast %60 : vector<1x32x32xbf16> to vector<32x32xbf16>
    %cst_16 = arith.constant dense<0.000000e+00> : vector<16x32xf32>
    %62 = tpu.matmul %59, %61, %cst_16 {dimension_numbers = #tpu.dot_dimension_numbers<[1], [0], [0], [1], [0, 0, 1, 1], [], []>} : vector<16x32xbf16>, vector<32x32xbf16>, vector<16x32xf32> -> vector<16x32xf32>
    %63 = vector.broadcast %8 : vector<1x32xf32> to vector<16x32xf32>
    %64 = arith.addf %62, %63 : vector<16x32xf32>
    %65 = arith.addf %64, %3 : vector<16x32xf32>
    %cst_17 = arith.constant dense<0.000000e+00> : vector<16xf32>
    %66 = vector.multi_reduction <add>, %65, %cst_17 [1] : vector<16x32xf32> to vector<16xf32>
    %67 = vector.shape_cast %66 : vector<16xf32> to vector<16x1xf32>
    %cst_18 = arith.constant 3.200000e+01 : f32
    %68 = vector.broadcast %cst_18 : f32 to vector<16x1xf32>
    %69 = arith.divf %67, %68 : vector<16x1xf32>
    %70 = vector.broadcast %69 : vector<16x1xf32> to vector<16x32xf32>
    %71 = arith.subf %65, %70 : vector<16x32xf32>
    %72 = arith.mulf %71, %71 : vector<16x32xf32>
    %cst_19 = arith.constant dense<0.000000e+00> : vector<16xf32>
    %73 = vector.multi_reduction <add>, %72, %cst_19 [1] : vector<16x32xf32> to vector<16xf32>
    %74 = vector.shape_cast %73 : vector<16xf32> to vector<16x1xf32>
    %cst_20 = arith.constant 3.200000e+01 : f32
    %75 = vector.broadcast %cst_20 : f32 to vector<16x1xf32>
    %76 = arith.divf %74, %75 : vector<16x1xf32>
    %77 = vector.broadcast %69 : vector<16x1xf32> to vector<16x32xf32>
    %78 = arith.subf %65, %77 : vector<16x32xf32>
    %cst_21 = arith.constant 9.99999974E-6 : f32
    %79 = vector.broadcast %cst_21 : f32 to vector<16x1xf32>
    %80 = arith.addf %76, %79 : vector<16x1xf32>
    %81 = math.rsqrt %80 : vector<16x1xf32>
    %82 = vector.broadcast %81 : vector<16x1xf32> to vector<16x32xf32>
    %83 = arith.mulf %78, %82 : vector<16x32xf32>
    %84 = vector.broadcast %9 : vector<1x32xf32> to vector<16x32xf32>
    %85 = arith.mulf %83, %84 : vector<16x32xf32>
    %86 = vector.broadcast %10 : vector<1x32xf32> to vector<16x32xf32>
    %87 = arith.addf %85, %86 : vector<16x32xf32>
    %88 = arith.truncf %87 : vector<16x32xf32> to vector<16x32xbf16>
    %c0_22 = arith.constant 0 : index
    %c0_23 = arith.constant 0 : index
    %c0_24 = arith.constant 0 : index
    %89 = vector.load %arg6[%c0_22, %c0_23, %c0_24] : memref<1x32x128xbf16, #tpu.memory_space<vmem>>, vector<1x32x128xbf16>
    %90 = vector.shape_cast %89 : vector<1x32x128xbf16> to vector<32x128xbf16>
    %cst_25 = arith.constant dense<0.000000e+00> : vector<16x128xf32>
    %91 = tpu.matmul %88, %90, %cst_25 {dimension_numbers = #tpu.dot_dimension_numbers<[1], [0], [0], [1], [0, 0, 1, 1], [], []>} : vector<16x32xbf16>, vector<32x128xbf16>, vector<16x128xf32> -> vector<16x128xf32>
    %92 = vector.broadcast %11 : vector<1x128xf32> to vector<16x128xf32>
    %93 = arith.addf %91, %92 : vector<16x128xf32>
    %cst_26 = arith.constant 0.000000e+00 : f32
    %94 = vector.broadcast %cst_26 : f32 to vector<16x128xf32>
    %95 = arith.maximumf %93, %94 : vector<16x128xf32>
    %96 = arith.truncf %95 : vector<16x128xf32> to vector<16x128xbf16>
    %c0_27 = arith.constant 0 : index
    %c0_28 = arith.constant 0 : index
    %c0_29 = arith.constant 0 : index
    %97 = vector.load %arg7[%c0_27, %c0_28, %c0_29] : memref<1x128x32xbf16, #tpu.memory_space<vmem>>, vector<1x128x32xbf16>
    %98 = vector.shape_cast %97 : vector<1x128x32xbf16> to vector<128x32xbf16>
    %cst_30 = arith.constant dense<0.000000e+00> : vector<16x32xf32>
    %99 = tpu.matmul %96, %98, %cst_30 {dimension_numbers = #tpu.dot_dimension_numbers<[1], [0], [0], [1], [0, 0, 1, 1], [], []>} : vector<16x128xbf16>, vector<128x32xbf16>, vector<16x32xf32> -> vector<16x32xf32>
    %100 = vector.broadcast %12 : vector<1x32xf32> to vector<16x32xf32>
    %101 = arith.addf %99, %100 : vector<16x32xf32>
    %102 = arith.addf %101, %87 : vector<16x32xf32>
    %cst_31 = arith.constant dense<0.000000e+00> : vector<16xf32>
    %103 = vector.multi_reduction <add>, %102, %cst_31 [1] : vector<16x32xf32> to vector<16xf32>
    %104 = vector.shape_cast %103 : vector<16xf32> to vector<16x1xf32>
    %cst_32 = arith.constant 3.200000e+01 : f32
    %105 = vector.broadcast %cst_32 : f32 to vector<16x1xf32>
    %106 = arith.divf %104, %105 : vector<16x1xf32>
    %107 = vector.broadcast %106 : vector<16x1xf32> to vector<16x32xf32>
    %108 = arith.subf %102, %107 : vector<16x32xf32>
    %109 = arith.mulf %108, %108 : vector<16x32xf32>
    %cst_33 = arith.constant dense<0.000000e+00> : vector<16xf32>
    %110 = vector.multi_reduction <add>, %109, %cst_33 [1] : vector<16x32xf32> to vector<16xf32>
    %111 = vector.shape_cast %110 : vector<16xf32> to vector<16x1xf32>
    %cst_34 = arith.constant 3.200000e+01 : f32
    %112 = vector.broadcast %cst_34 : f32 to vector<16x1xf32>
    %113 = arith.divf %111, %112 : vector<16x1xf32>
    %114 = vector.broadcast %106 : vector<16x1xf32> to vector<16x32xf32>
    %115 = arith.subf %102, %114 : vector<16x32xf32>
    %cst_35 = arith.constant 9.99999974E-6 : f32
    %116 = vector.broadcast %cst_35 : f32 to vector<16x1xf32>
    %117 = arith.addf %113, %116 : vector<16x1xf32>
    %118 = math.rsqrt %117 : vector<16x1xf32>
    %119 = vector.broadcast %118 : vector<16x1xf32> to vector<16x32xf32>
    %120 = arith.mulf %115, %119 : vector<16x32xf32>
    %121 = vector.broadcast %13 : vector<1x32xf32> to vector<16x32xf32>
    %122 = arith.mulf %120, %121 : vector<16x32xf32>
    %123 = vector.broadcast %14 : vector<1x32xf32> to vector<16x32xf32>
    %124 = arith.addf %122, %123 : vector<16x32xf32>
    %c0_36 = arith.constant 0 : index
    %c0_37 = arith.constant 0 : index
    %125 = vector.load %arg12[%c0_36, %c0_37] : memref<16x32xf32, #tpu.memory_space<vmem>>, vector<16x32xf32>
    tpu.vector_store %arg12[%c0_36, %c0_37], %124 {strides = array<i32>} : memref<16x32xf32, #tpu.memory_space<vmem>>, vector<16x32xf32>,
    %c1_i32 = arith.constant 1 : i32
    %126 = arith.cmpi eq, %arg1, %c1_i32 : i32
    %127 = arith.extui %126 : i1 to i32
    %c0_i32_38 = arith.constant 0 : i32
    %128 = arith.cmpi ne, %127, %c0_i32_38 : i32
    scf.if %128 {
      %129 = vector.shape_cast %124 : vector<16x32xf32> to vector<2x8x32xf32>
      %cst_39 = arith.constant dense<0xFF800000> : vector<2x32xf32>
      %130 = vector.multi_reduction <maximumf>, %129, %cst_39 [1] : vector<2x8x32xf32> to vector<2x32xf32>
      %131 = arith.truncf %130 : vector<2x32xf32> to vector<2x32xbf16>
      %c0_40 = arith.constant 0 : index
      %c0_41 = arith.constant 0 : index
      %132 = vector.load %arg9[%c0_40, %c0_41] : memref<32x128xbf16, #tpu.memory_space<vmem>>, vector<32x128xbf16>
      %cst_42 = arith.constant dense<0.000000e+00> : vector<2x128xf32>
      %133 = tpu.matmul %131, %132, %cst_42 {dimension_numbers = #tpu.dot_dimension_numbers<[1], [0], [0], [1], [0, 0, 1, 1], [], []>} : vector<2x32xbf16>, vector<32x128xbf16>, vector<2x128xf32> -> vector<2x128xf32>
      %c0_43 = arith.constant 0 : index
      %c0_44 = arith.constant 0 : index
      %134 = vector.load %arg10[%c0_43, %c0_44] : memref<1x128xf32, #tpu.memory_space<vmem>>, vector<1x128xf32>
      %135 = vector.broadcast %134 : vector<1x128xf32> to vector<2x128xf32>
      %136 = arith.addf %133, %135 : vector<2x128xf32>
      %137 = vector.shape_cast %136 : vector<2x128xf32> to vector<1x2x128xf32>
      %c0_45 = arith.constant 0 : index
      %c0_46 = arith.constant 0 : index
      %c0_47 = arith.constant 0 : index
      %138 = vector.load %arg11[%c0_45, %c0_46, %c0_47] : memref<1x2x128xf32, #tpu.memory_space<vmem>>, vector<1x2x128xf32>
      tpu.vector_store %arg11[%c0_45, %c0_46, %c0_47], %137 {strides = array<i32>} : memref<1x2x128xf32, #tpu.memory_space<vmem>>, vector<1x2x128xf32>,
    } else {
    }
    return
  }
  func.func @transform_0(%arg0: i32, %arg1: i32) -> (i32, i32, i32) {
    %c0_i32 = arith.constant 0 : i32
    %c0_i32_0 = arith.constant 0 : i32
    %c0_i32_1 = arith.constant 0 : i32
    return %arg0, %c0_i32, %c0_i32_0 : i32, i32, i32
  }
  func.func @transform_1(%arg0: i32, %arg1: i32) -> (i32, i32, i32) {
    %c0_i32 = arith.constant 0 : i32
    %c0_i32_0 = arith.constant 0 : i32
    %c0_i32_1 = arith.constant 0 : i32
    %c0_i32_2 = arith.constant 0 : i32
    return %c0_i32, %c0_i32_0, %c0_i32_1 : i32, i32, i32
  }
  func.func @transform_2(%arg0: i32, %arg1: i32) -> (i32, i32, i32) {
    %c0_i32 = arith.constant 0 : i32
    %c0_i32_0 = arith.constant 0 : i32
    %c0_i32_1 = arith.constant 0 : i32
    return %arg1, %c0_i32, %c0_i32_0 : i32, i32, i32
  }
  func.func @transform_3(%arg0: i32, %arg1: i32) -> (i32, i32, i32) {
    %c0_i32 = arith.constant 0 : i32
    %c0_i32_0 = arith.constant 0 : i32
    %c0_i32_1 = arith.constant 0 : i32
    return %arg1, %c0_i32, %c0_i32_0 : i32, i32, i32
  }
  func.func @transform_4(%arg0: i32, %arg1: i32) -> (i32, i32, i32) {
    %c0_i32 = arith.constant 0 : i32
    %c0_i32_0 = arith.constant 0 : i32
    %c0_i32_1 = arith.constant 0 : i32
    return %arg1, %c0_i32, %c0_i32_0 : i32, i32, i32
  }
  func.func @transform_5(%arg0: i32, %arg1: i32) -> (i32, i32, i32) {
    %c0_i32 = arith.constant 0 : i32
    %c0_i32_0 = arith.constant 0 : i32
    %c0_i32_1 = arith.constant 0 : i32
    return %arg1, %c0_i32, %c0_i32_0 : i32, i32, i32
  }
  func.func @transform_6(%arg0: i32, %arg1: i32) -> (i32, i32, i32) {
    %c0_i32 = arith.constant 0 : i32
    %c0_i32_0 = arith.constant 0 : i32
    %c0_i32_1 = arith.constant 0 : i32
    return %arg1, %c0_i32, %c0_i32_0 : i32, i32, i32
  }
  func.func @transform_7(%arg0: i32, %arg1: i32) -> (i32, i32) {
    %c0_i32 = arith.constant 0 : i32
    %c0_i32_0 = arith.constant 0 : i32
    %c0_i32_1 = arith.constant 0 : i32
    return %c0_i32, %c0_i32_0 : i32, i32
  }
  func.func @transform_8(%arg0: i32, %arg1: i32) -> (i32, i32) {
    %c0_i32 = arith.constant 0 : i32
    %c0_i32_0 = arith.constant 0 : i32
    %c0_i32_1 = arith.constant 0 : i32
    return %c0_i32, %c0_i32_0 : i32, i32
  }
  func.func @transform_9(%arg0: i32, %arg1: i32) -> (i32, i32, i32) {
    %c0_i32 = arith.constant 0 : i32
    %c0_i32_0 = arith.constant 0 : i32
    %c0_i32_1 = arith.constant 0 : i32
    return %arg0, %c0_i32, %c0_i32_0 : i32, i32, i32
  }
}

</mosaic_0001>

<bundles_post_ra>
// kernel: tpu_custom_call.1
= control target key start
LH: loop header
LB: loop body
LE: loop exit
PB: predicated region body
PF: predicated region fallthrough
CT: control target
= control target key end

     0   :  { %14 = vsyncpa [#allocation4], 0  ;;  %s1800_s30 = smov 0   ;;  %s1802_s10 = smov 0   ;;  %s2042_s0 = inlined_call_operand.vmem [shape: f32[2,8,32], index: 0, kind: input, shape index: {}]   ;;  %s2043_s1 = inlined_call_operand.vmem [shape: f32[1,8,32], index: 1, kind: input, shape index: {}]   ;;  %s2044_s2 = inlined_call_operand.vmem [shape: bf16[2,8,24], index: 2, kind: input, shape index: {}]   ;;  %s2045_s3 = inlined_call_operand.vmem [shape: bf16[2,32,32], index: 3, kind: input, shape index: {}]   ;;  %s2046_s4 = inlined_call_operand.vmem [shape: bf16[2,32,128], index: 4, kind: input, shape index: {}]   ;;  %s2047_s5 = inlined_call_operand.vmem [shape: bf16[2,128,32], index: 5, kind: input, shape index: {}]   ;;  %s2048_s6 = inlined_call_operand.vmem [shape: f32[2,8,128], index: 6, kind: input, shape index: {}]   ;;  %s2049_s7 = inlined_call_operand.vmem [shape: bf16[32,128], index: 7, kind: input, shape index: {}]   ;;  %s2050_s8 = inlined_call_operand.vmem [shape: f32[1,128], index: 8, kind: input, shape index: {}]   ;;  %s2051_s9 = inlined_call_operand.hbm [shape: f32[1,2,128], index: 9, kind: output, shape index: {}]  }
   0x1   :  { %s1804_s11 = smov 0  }
   0x2 LB: > { %s29_s13 = sadd.s32 1, %s1736_s10  ;;  %p1479_p1 = scmp.ge.s32.totalorder %s1740_s11, 1  ;;  %s1740_s11 = sphi %s1804_s11, %s20_s11   ;;  %s1736_s10 = sphi %s1802_s10, %s2056_s10   ;;  %s1732_s30 = sphi %s1800_s30, %s2055_s30  }
   0x3   : > { %p30_p0 = scmp.ge.s32.totalorder %s29_s13, 2  ;;  %p349_p2 = scmp.lt.s32.totalorder %s1740_s11, 3 }
   0x5   : > { %s2058_s13 = smov (%p30_p0, %s29_s13), 0  ;;  %p350_p3 = pnand %p1479_p1, %p349_p2 }
   0x6   : > { %2052 = sst [smem:[#allocation6_spill]] %s2058_s13  ;;  %p409_p4 = scmp.lt.s32.totalorder (!%p350_p3), %s1732_s30, 1 }
   0x7   : > { %353 = sbr.rel (%p350_p3) target bundleno = 2216 (0x8a8), region = 56  ;;  %p1488_p5 = scmp.ne.s32.totalorder (!%p350_p3), %s1732_s30, 0 }
   0xc   : > { %s410_s14 = scalar_select %p409_p4, %s1732_s30, 1 }
   0xe   : > { %s1480_s15 = sshll.u32 %s410_s14, 2  ;;  %s1573_s16 = sshll.u32 %s410_s14, 4 }
   0xf   : > { %s412_s19 = scalar_lea.vmem %s2044_s2, %s1480_s15  ;;  %s1829_s22 = scalar_lea.vmem %s2045_s3, %s1573_s16 }
  0x10   : > { %s1834_s25 = scalar_lea.vmem %s2046_s4, %s1573_s16  ;;  %s1575_s26 = sshll.u32 %s410_s14, 6 }
  0x11   : > { %s1839_s29 = scalar_lea.vmem %s2047_s5, %s1575_s26  ;;  %s1487_s12 = sshll.u32 %s410_s14, 3 }
  0x12   : > { %s1844_s15 = scalar_lea.vmem %s2048_s6, %s1487_s12  ;;  %436 = sbr.rel (%p1488_p5) target bundleno = 29 (0x1d), region = 60 }
  0x17   : > { %v437_v0 = vld [vmem:[%s2042_s0] sm:$0xff]  ;;  %vm442_vm0 = vcmask 261120   ;;  %v438_v2 = vld [vmem:[%s2042_s0 + $0x8] sm:$0xff] }
  0x18   : > { %v439_v1 = vld [vmem:[%s2043_s1] sm:$0xff] }
  0x19   : > { %v440_v3 = vadd.f32 %v439_v1, %v437_v0  ;;  %v441_v4 = vadd.f32 %v439_v1, %v438_v2 }
  0x1b   : > { %443 = vst.msk [vmem:[#allocation2] sm:$0xff] %vm442_vm0, %v440_v3 }
  0x1c   : > { %444 = vst.msk [vmem:[#allocation2 + $0x8] sm:$0xff] %vm442_vm0, %v441_v4 }
  0x1d PF: > { %v461_v5 = vld [vmem:[%s412_s19] sm:$0xf]  ;;  %vm476_vm1 = vcmask 1043456   ;;  %vm463_vm2 = vcmask 64512   ;;  %s1742_s12 = smov 120   ;;  %s1743_s13 = smov 104  }
  0x1e   : > { %v478_v8 = vsel %vm476_vm1, %v461_v5, 0  ;;  %s1744_s14 = smov 112   ;;  %v1870_v15 = vld [vmem:[%s1844_s15] sm:$0xff]  ;;  %s1745_s19 = smov 8   ;;  %vm1015_vm3 = vcmask 130048   ;;  %vm1018_vm4 = vcmask 195584  }
  0x1f   : > { %487 = vmatpush.bf16.msra.mxu0 %v478_v8  ;;  %v462_v16 = vperm.slane %v1870_v15, 0  ;;  %s1746_s26 = smov 16   ;;  %s1747_s27 = smov 24   ;;  %vm1039_vm5 = vcmask 261120  }
  0x20   : > { %p1559_p6 = scmp.ne.s32.totalorder %s1732_s30, 1 }
  0x22   : > { %v1856_v6 = vld [vmem:[#allocation2] sm:$0xff] }
  0x23   : > { %v1858_v7 = vld [vmem:[#allocation2 + $0x8] sm:$0xff]  ;;  %v447_v9 = vpack.c.bf16 %v1856_v6, %v1856_v6 }
  0x24   : > { %v448_v10 = vpack.c.bf16 %v1858_v7, %v1858_v7 }
  0x25   : > { %v452_v11 = vunpack.c.l.b16 %v447_v9 }
  0x26   : > { %v453_v12 = vunpack.c.l.b16 %v448_v10 }
  0x28   : > { %v454_v13 = vpack.c.b16 %v453_v12, %v452_v11 }
  0x2a   : > { %455 = vrot.lane.b32.xlu0 %v454_v13, %s1742_s12  ;;  %1489 = vmatmul.msk.bf16.vlgmr.msra.gmra.mxu0 %vm463_vm2, %v454_v13 }
  0x2b   : > { %459 = vrot.lane.b32.xlu1 %v454_v13, %s1743_s13 }
  0x32   : > { %457 = vrot.lane.b32.xlu0 %v454_v13, %s1744_s14 }
  0x9c   : > { %v456_v14 = vpop.permute.xlu0 %455 }
  0x9d   : > { %1490 = vmatmul.msk.bf16.gmra.mxu0 %vm463_vm2, %v456_v14  ;;  %v460_v28 = vpop.permute.xlu1 %459 }
  0xa4   : > { %v458_v19 = vpop.permute.xlu0 %457 }
  0xa7   : > { %v489_v17 = vpop.f32.mrf.mxu0 }
  0xa8   : > { %v490_v18 = vadd.f32 %v489_v17, %v462_v16 }
  0xaa   : > { %v525_v20 = vpack.c.bf16 %v490_v18, %v490_v18  ;;  %v509_v31 = vmul.f32 0.35355338, %v490_v18 }
  0xac   : > { %v534_v21 = vunpack.c.l.b16 %v525_v20  ;;  %v517_v32 = vpack.c.bf16 %v509_v31, %v509_v31 }
  0xad   : > { %1491 = vmatmul.msk.bf16.gmra.mxu0 %vm463_vm2, %v458_v19 }
  0xae   : > { %v535_v22 = vpack.c.b16 %v534_v21, %v534_v21 }
  0xaf   : > { %v491_v23 = vpop.f32.mrf.mxu0 }
  0xb0   : > { %v492_v24 = vadd.f32 %v491_v23, %v462_v16  ;;  %536 = vrot.lane.b32.xlu2 %v535_v22, %s1742_s12 }
  0xb2   : > { %v526_v25 = vpack.c.bf16 %v492_v24, %v492_v24  ;;  %v510_v47 = vmul.f32 0.35355338, %v492_v24 }
  0xb4   : > { %v558_v26 = vunpack.c.l.b16 %v526_v25  ;;  %v518_v50 = vpack.c.bf16 %v510_v47, %v510_v47 }
  0xb6   : > { %v1875_v27 = vpack.c.b16 %v558_v26, %v558_v26 }
  0xb8   : > { %560 = vrot.lane.b32.xlu1 %v1875_v27, %s1742_s12 }
  0xbd   : > { %1492 = vmatmul.msk.bf16.gmra.mxu0 %vm463_vm2, %v460_v28 }
 0x10a   : > { %v537_v29 = vpop.permute.xlu2 %536 }
 0x10b   : > { %v542_v30 = vsel %vm463_vm2, %v537_v29, 0 }
 0x10c   : > { %551 = vmatpush.bf16.xpose.msra.mxu1 %v542_v30 }
 0x113   : > { %1493 = vmatmul.msk.bf16.vlgmr.msra.gmra.mxu1 %vm463_vm2, %v517_v32 }
 0x11a   : > { %v494_v33 = vpop.f32.mrf.mxu0 }
 0x11b   : > { %v495_v34 = vadd.f32 %v494_v33, %v462_v16 }
 0x11d   : > { %v527_v35 = vpack.c.bf16 %v495_v34, %v495_v34  ;;  %v511_v5 = vmul.f32 0.35355338, %v495_v34 }
 0x11f   : > { %v582_v36 = vunpack.c.l.b16 %v527_v35  ;;  %v519_v8 = vpack.c.bf16 %v511_v5, %v511_v5 }
 0x121   : > { %v583_v37 = vpack.c.b16 %v582_v36, %v582_v36 }
 0x122   : > { %v496_v38 = vpop.f32.mrf.mxu0 }
 0x123   : > { %v497_v39 = vadd.f32 %v496_v38, %v462_v16  ;;  %584 = vrot.lane.b32.xlu2 %v583_v37, %s1742_s12 }
 0x125   : > { %v528_v40 = vpack.c.bf16 %v497_v39, %v497_v39  ;;  %v512_v14 = vmul.f32 0.35355338, %v497_v39 }
 0x127   : > { %v606_v41 = vunpack.c.l.b16 %v528_v40 }
 0x129   : > { %v1883_v42 = vpack.c.b16 %v606_v41, %v606_v41 }
 0x12a   : > { %v499_v43 = vpop.f32.mrf.mxu0  ;;  %v561_v44 = vpop.permute.xlu1 %560 }
 0x12b   : > { %v500_v45 = vadd.f32 %v499_v43, %v462_v16  ;;  %608 = vrot.lane.b32.xlu1 %v1883_v42, %s1742_s12  ;;  %v566_v46 = vsel %vm463_vm2, %v561_v44, 0 }
 0x12c   : > { %575 = vmatpush.bf16.xpose.msra.mxu3 %v566_v46 }
 0x12d   : > { %v529_v48 = vpack.c.bf16 %v500_v45, %v500_v45  ;;  %v513_v21 = vmul.f32 0.35355338, %v500_v45 }
 0x12f   : > { %v630_v49 = vunpack.c.l.b16 %v529_v48 }
 0x131   : > { %v1888_v51 = vpack.c.b16 %v630_v49, %v630_v49 }
 0x132   : > { %v501_v52 = vpop.f32.mrf.mxu0 }
 0x133   : > { %v502_v53 = vadd.f32 %v501_v52, %v462_v16  ;;  %632 = vrot.lane.b32.xlu0 %v1888_v51, %s1742_s12  ;;  %1494 = vmatmul.msk.bf16.vlgmr.msra.gmra.mxu3 %vm463_vm2, %v518_v50 }
 0x135   : > { %v530_v54 = vpack.c.bf16 %v502_v53, %v502_v53  ;;  %v514_v25 = vmul.f32 0.35355338, %v502_v53 }
 0x137   : > { %v654_v55 = vunpack.c.l.b16 %v530_v54  ;;  %v522_v26 = vpack.c.bf16 %v514_v25, %v514_v25 }
 0x139   : > { %v1893_v56 = vpack.c.b16 %v654_v55, %v654_v55 }
 0x13a   : > { %v504_v57 = vpop.f32.mrf.mxu0 }
 0x13b   : > { %v505_v58 = vadd.f32 %v504_v57, %v462_v16  ;;  %656 = vrot.lane.b32.xlu0 %v1893_v56, %s1742_s12 }
 0x13d   : > { %v531_v59 = vpack.c.bf16 %v505_v58, %v505_v58  ;;  %v515_v34 = vmul.f32 0.35355338, %v505_v58 }
 0x13f   : > { %v678_v60 = vunpack.c.l.b16 %v531_v59  ;;  %v523_v36 = vpack.c.bf16 %v515_v34, %v515_v34 }
 0x141   : > { %v1897_v61 = vpack.c.b16 %v678_v60, %v678_v60 }
 0x142   : > { %v506_v62 = vpop.f32.mrf.mxu0 }
 0x143   : > { %863 = vrot.lane.b32.xlu0 %v583_v37, %s1744_s14  ;;  %680 = vrot.lane.b32.xlu1 %v1897_v61, %s1742_s12  ;;  %v507_v63 = vadd.f32 %v506_v62, %v462_v16  ;;  %v520_v16 = vpack.c.bf16 %v512_v14, %v512_v14 }
 0x145   : > { %v532_v0 = vpack.c.bf16 %v507_v63, %v507_v63  ;;  %v516_v35 = vmul.f32 0.35355338, %v507_v63 }
 0x147   : > { %v702_v1 = vunpack.c.l.b16 %v532_v0  ;;  %v524_v37 = vpack.c.bf16 %v516_v35, %v516_v35 }
 0x149   : > { %v1902_v2 = vpack.c.b16 %v702_v1, %v702_v1 }
 0x14b   : > { %821 = vrot.lane.b32.xlu1 %v535_v22, %s1744_s14  ;;  %704 = vrot.lane.b32.xlu2 %v1902_v2, %s1742_s12  ;;  %v521_v22 = vpack.c.bf16 %v513_v21, %v513_v21 }
 0x17d   : > { %v585_v3 = vpop.permute.xlu2 %584 }
 0x17e   : > { %v590_v4 = vsel %vm463_vm2, %v585_v3, 0 }
 0x17f   : > { %599 = vmatpush.bf16.xpose.msrb.mxu3 %v590_v4 }
 0x186   : > { %1495 = vmatmul.msk.bf16.vlgmr.msrb.gmra.mxu3 %vm463_vm2, %v519_v8 }
 0x190   : > { %v553_v9 = vpop.f32.mrf.mxu1 }
 0x191   : > { %v725_v10 = vsel %vm463_vm2, %v553_v9, -inf }
 0x192   : > { %726 = vmax.xlane.f32.xlu2 %v725_v10 }
 0x198   : > { %v555_v11 = vpop.f32.mrf.mxu1 }
 0x19d   : > { %v609_v12 = vpop.permute.xlu1 %608 }
 0x19e   : > { %v614_v13 = vsel %vm463_vm2, %v609_v12, 0 }
 0x19f   : > { %623 = vmatpush.bf16.xpose.msrb.mxu1 %v614_v13 }
 0x1a5   : > { %v633_v17 = vpop.permute.xlu0 %632  ;;  %v705_v18 = vpop.permute.xlu2 %704 }
 0x1a6   : > { %1496 = vmatmul.msk.bf16.vlgmr.msrb.gmra.mxu1 %vm463_vm2, %v520_v16  ;;  %v638_v19 = vsel %vm463_vm2, %v633_v17, 0  ;;  %v710_v20 = vsel %vm463_vm2, %v705_v18, 0 }
 0x1a7   : > { %647 = vmatpush.bf16.xpose.msra.mxu2 %v638_v19 }
 0x1ad   : > { %v657_v23 = vpop.permute.xlu0 %656 }
 0x1ae   : > { %v662_v24 = vsel %vm463_vm2, %v657_v23, 0  ;;  %1497 = vmatmul.msk.bf16.vlgmr.msra.gmra.mxu2 %vm463_vm2, %v521_v22 }
 0x1af   : > { %719 = vmatpush.bf16.xpose.msrb.mxu2 %v710_v20  ;;  %671 = vmatpush.bf16.xpose.msra.mxu3 %v662_v24 }
 0x1b5   : > { %v864_v28 = vpop.permute.xlu0 %863  ;;  %v681_v29 = vpop.permute.xlu1 %680 }
 0x1b6   : > { %v869_v30 = vsel %vm476_vm1, %v864_v28, 0  ;;  %v686_v31 = vsel %vm463_vm2, %v681_v29, 0  ;;  %v577_v32 = vpop.f32.mrf.mxu3  ;;  %1498 = vmatmul.msk.bf16.vlgmr.msra.gmra.mxu3 %vm463_vm2, %v522_v26 }
 0x1b7   : > { %695 = vmatpush.bf16.xpose.msra.mxu1 %v686_v31  ;;  %878 = vmatpush.bf16.msra.mxu2 %v869_v30  ;;  %v728_v33 = vsel %vm463_vm2, %v577_v32, -inf }
 0x1b8   : > { %729 = vmax.xlane.f32.xlu2 %v728_v33 }
 0x1bd   : > { %v822_v38 = vpop.permute.xlu1 %821 }
 0x1be   : > { %v827_v39 = vsel %vm476_vm1, %v822_v38, 0  ;;  %v579_v40 = vpop.f32.mrf.mxu3  ;;  %1499 = vmatmul.msk.bf16.vlgmr.msra.gmra.mxu1 %vm463_vm2, %v523_v36  ;;  %1500 = vmatmul.msk.bf16.vlgmr.msrb.gmra.mxu2 %vm463_vm2, %v524_v37 }
 0x1bf   : > { %836 = vmatpush.bf16.msrb.mxu3 %v827_v39 }
 0x205   : > { %v727_v41 = vpop.xlane.xlu2 %726 }
 0x206   : > { %v749_v43 = vsub.f32 %v553_v9, %v727_v41 }
 0x208   : > { %v757_v44 = vmul.f32 1.442695, %v749_v43 }
 0x209   : > { %v601_v45 = vpop.f32.mrf.mxu3 }
 0x20a   : > { %1643 = vpow2.f32 %v757_v44  ;;  %v731_v46 = vsel %vm463_vm2, %v601_v45, -inf }
 0x20b   : > { %732 = vmax.xlane.f32.xlu0 %v731_v46 }
 0x210   : > { %v1644_v47 = vpop.eup %1643 }
 0x211   : > { %v603_v48 = vpop.f32.mrf.mxu3  ;;  %v773_v49 = vsel %vm463_vm2, %v1644_v47, 0.0 }
 0x213   : > { %774 = vadd.xlane.f32.xlu0 %v773_v49 }
 0x223   : > { %v625_v50 = vpop.f32.mrf.mxu1 }
 0x224   : > { %v734_v52 = vsel %vm463_vm2, %v625_v50, -inf }
 0x225   : > { %735 = vmax.xlane.f32.xlu1 %v734_v52 }
 0x22b   : > { %v730_v53 = vpop.xlane.xlu2 %729  ;;  %v627_v54 = vpop.f32.mrf.mxu1 }
 0x22c   : > { %v750_v55 = vsub.f32 %v577_v32, %v730_v53 }
 0x22e   : > { %v759_v57 = vmul.f32 1.442695, %v750_v55 }
 0x230   : > { %1645 = vpow2.f32 %v759_v57 }
 0x231   : > { %v649_v58 = vpop.f32.mrf.mxu2 }
 0x232   : > { %v737_v59 = vsel %vm463_vm2, %v649_v58, -inf }
 0x233   : > { %738 = vmax.xlane.f32.xlu1 %v737_v59 }
 0x236   : > { %v1646_v60 = vpop.eup %1645 }
 0x237   : > { %v776_v62 = vsel %vm463_vm2, %v1646_v60, 0.0 }
 0x238   : > { %777 = vadd.xlane.f32.xlu2 %v776_v62 }
 0x239   : > { %v651_v63 = vpop.f32.mrf.mxu2  ;;  %v673_v0 = vpop.f32.mrf.mxu3 }
 0x23a   : > { %v740_v3 = vsel %vm463_vm2, %v673_v0, -inf }
 0x23b   : > { %v697_v1 = vpop.f32.mrf.mxu1 }
 0x23c   : > { %v743_v10 = vsel %vm463_vm2, %v697_v1, -inf }
 0x240   : > { %741 = vmax.xlane.f32.xlu2 %v740_v3 }
 0x241   : > { %v675_v4 = vpop.f32.mrf.mxu3  ;;  %v721_v5 = vpop.f32.mrf.mxu2 }
 0x242   : > { %v746_v8 = vsel %vm463_vm2, %v721_v5, -inf }
 0x243   : > { %747 = vmax.xlane.f32.xlu0 %v746_v8  ;;  %v699_v9 = vpop.f32.mrf.mxu1 }
 0x248   : > { %744 = vmax.xlane.f32.xlu2 %v743_v10 }
 0x249   : > { %v723_v11 = vpop.f32.mrf.mxu2 }
 0x24c   : > { %842 = vrot.lane.b32.xlu1 %v1875_v27, %s1744_s14 }
 0x257   : > { %947 = vrot.lane.b32.xlu0 %v1897_v61, %s1744_s14 }
 0x260   : > { %884 = vrot.lane.b32.xlu2 %v1883_v42, %s1744_s14 }
 0x27e   : > { %v733_v12 = vpop.xlane.xlu0 %732 }
 0x27f   : > { %v751_v13 = vsub.f32 %v601_v45, %v733_v12 }
 0x281   : > { %v761_v14 = vmul.f32 1.442695, %v751_v13 }
 0x283   : > { %1647 = vpow2.f32 %v761_v14 }
 0x286   : > { %v775_v16 = vpop.xlane.xlu0 %774 }
 0x287   : > { %1649 = vrcp.f32 %v775_v16 }
 0x289   : > { %v1937_v17 = vpop.eup %1647 }
 0x28a   : > { %v779_v18 = vsel %vm463_vm2, %v1937_v17, 0.0 }
 0x28b   : > { %780 = vadd.xlane.f32.xlu2 %v779_v18 }
 0x28d   : > { %v1650_v19 = vpop.eup %1649 }
 0x28e   : > { %v805_v27 = vmul.f32 %v1650_v19, %v1644_v47 }
 0x290   : > { %v813_v20 = vpack.c.bf16 %v805_v27, %v805_v27 }
 0x292   : > { %1501 = vmatmul.msk.bf16.vlgmr.msrb.gmra.mxu3 %vm463_vm2, %v813_v20 }
 0x298   : > { %v736_v61 = vpop.xlane.xlu1 %735 }
 0x299   : > { %v752_v21 = vsub.f32 %v625_v50, %v736_v61 }
 0x29b   : > { %v763_v42 = vmul.f32 1.442695, %v752_v21 }
 0x29d   : > { %1651 = vpow2.f32 %v763_v42 }
 0x2a3   : > { %v1652_v22 = vpop.eup %1651 }
 0x2a4   : > { %v782_v23 = vsel %vm463_vm2, %v1652_v22, 0.0 }
 0x2a5   : > { %783 = vadd.xlane.f32.xlu0 %v782_v23 }
 0x2a6   : > { %v739_v24 = vpop.xlane.xlu1 %738 }
 0x2a7   : > { %v753_v25 = vsub.f32 %v649_v58, %v739_v24 }
 0x2a9   : > { %v765_v26 = vmul.f32 1.442695, %v753_v25 }
 0x2ab   : > { %1653 = vpow2.f32 %v765_v26  ;;  %v778_v28 = vpop.xlane.xlu2 %777 }
 0x2ac   : > { %1655 = vrcp.f32 %v778_v28 }
 0x2b1   : > { %v1654_v29 = vpop.eup %1653 }
 0x2b2   : > { %v785_v30 = vsel %vm463_vm2, %v1654_v29, 0.0  ;;  %v1656_v37 = vpop.eup %1655 }
 0x2b3   : > { %v742_v31 = vpop.xlane.xlu2 %741  ;;  %786 = vadd.xlane.f32.xlu2 %v785_v30  ;;  %v806_v40 = vmul.f32 %v1656_v37, %v1646_v60 }
 0x2b4   : > { %v754_v32 = vsub.f32 %v673_v0, %v742_v31 }
 0x2b5   : > { %v814_v48 = vpack.c.bf16 %v806_v40, %v806_v40 }
 0x2b6   : > { %v767_v33 = vmul.f32 1.442695, %v754_v32  ;;  %v748_v34 = vpop.xlane.xlu0 %747 }
 0x2b7   : > { %v756_v35 = vsub.f32 %v721_v5, %v748_v34 }
 0x2b8   : > { %1657 = vpow2.f32 %v767_v33 }
 0x2b9   : > { %v771_v36 = vmul.f32 1.442695, %v756_v35 }
 0x2bb   : > { %1659 = vpow2.f32 %v771_v36  ;;  %v745_v38 = vpop.xlane.xlu2 %744 }
 0x2bc   : > { %v755_v39 = vsub.f32 %v697_v1, %v745_v38 }
 0x2be   : > { %v1658_v41 = vpop.eup %1657  ;;  %v769_v43 = vmul.f32 1.442695, %v755_v39  ;;  %v843_v44 = vpop.permute.xlu1 %842 }
 0x2bf   : > { %v848_v45 = vsel %vm476_vm1, %v843_v44, 0  ;;  %v788_v46 = vsel %vm463_vm2, %v1658_v41, 0.0  ;;  %v1577_v44 = vld [vmem:[%s1829_s22 + $0x8] sm:$0xff] }
 0x2c0   : > { %1661 = vpow2.f32 %v769_v43  ;;  %789 = vadd.xlane.f32.xlu1 %v788_v46  ;;  %857 = vmatpush.bf16.msrb.mxu1 %v848_v45  ;;  %v1576_v45 = vld [vmem:[%s1829_s22] sm:$0xff] }
 0x2c1   : > { %v1660_v47 = vpop.eup %1659 }
 0x2c2   : > { %v794_v49 = vsel %vm463_vm2, %v1660_v47, 0.0 }
 0x2c3   : > { %795 = vadd.xlane.f32.xlu0 %v794_v49  ;;  %1502 = vmatmul.msk.bf16.vlgmr.msrb.gmra.mxu1 %vm463_vm2, %v814_v48  ;;  %v885_v50 = vpop.permute.xlu2 %884 }
 0x2c4   : > { %v890_v52 = vsel %vm476_vm1, %v885_v50, 0 }
 0x2c5   : > { %899 = vmatpush.bf16.msra.mxu3 %v890_v52 }
 0x2c6   : > { %v1662_v53 = vpop.eup %1661 }
 0x2c7   : > { %v791_v54 = vsel %vm463_vm2, %v1662_v53, 0.0 }
 0x2c8   : > { %792 = vadd.xlane.f32.xlu1 %v791_v54 }
 0x2c9   : > { %v948_v55 = vpop.permute.xlu0 %947 }
 0x2ca   : > { %v953_v57 = vsel %vm476_vm1, %v948_v55, 0 }
 0x2cb   : > { %962 = vmatpush.bf16.msrb.mxu2 %v953_v57  ;;  %905 = vrot.lane.b32.xlu2 %v1888_v51, %s1744_s14 }
 0x2d7   : > { %926 = vrot.lane.b32.xlu0 %v1893_v56, %s1744_s14 }
 0x2e1   : > { %968 = vrot.lane.b32.xlu1 %v1902_v2, %s1744_s14 }
 0x2fe   : > { %v781_v58 = vpop.xlane.xlu2 %780 }
 0x2ff   : > { %1663 = vrcp.f32 %v781_v58 }
 0x305   : > { %v1664_v59 = vpop.eup %1663 }
 0x306   : > { %v807_v60 = vmul.f32 %v1664_v59, %v1937_v17 }
 0x308   : > { %v815_v62 = vpack.c.bf16 %v807_v60, %v807_v60 }
 0x30a   : > { %1503 = vmatmul.msk.bf16.vlgmr.msra.gmra.mxu2 %vm463_vm2, %v815_v62 }
 0x315   : > { %v1959_v63 = vpop.f32.mrf.mxu3 }
 0x318   : > { %v784_v0 = vpop.xlane.xlu0 %783 }
 0x319   : > { %1665 = vrcp.f32 %v784_v0 }
 0x31d   : > { %v840_v1 = vpop.f32.mrf.mxu3 }
 0x31f   : > { %v1666_v51 = vpop.eup %1665 }
 0x320   : > { %v808_v3 = vmul.f32 %v1666_v51, %v1652_v22  ;;  %v1026_v51 = vperm.slane %v1870_v15, 1 }
 0x322   : > { %v816_v4 = vpack.c.bf16 %v808_v3, %v808_v3 }
 0x324   : > { %1504 = vmatmul.msk.bf16.vlgmr.msra.gmra.mxu3 %vm463_vm2, %v816_v4 }
 0x326   : > { %v787_v56 = vpop.xlane.xlu2 %786 }
 0x327   : > { %1667 = vrcp.f32 %v787_v56 }
 0x32d   : > { %v1668_v2 = vpop.eup %1667 }
 0x32e   : > { %v809_v5 = vmul.f32 %v1668_v2, %v1654_v29  ;;  %v906_v8 = vpop.permute.xlu2 %905 }
 0x32f   : > { %v911_v9 = vsel %vm476_vm1, %v906_v8, 0 }
 0x330   : > { %920 = vmatpush.bf16.msrb.mxu0 %v911_v9  ;;  %v817_v10 = vpack.c.bf16 %v809_v5, %v809_v5 }
 0x333   : > { %v790_v11 = vpop.xlane.xlu1 %789  ;;  %1505 = vmatmul.msk.bf16.vlgmr.msrb.gmra.mxu0 %vm463_vm2, %v817_v10  ;;  %v1748_v10 = vmov 32.0  }
 0x334   : > { %1049 = vmatpush.bf16.msra.mxu0 %v1577_v44 }
 0x336   : > { %v796_v14 = vpop.xlane.xlu0 %795 }
 0x338   : > { %1050 = vmatpush.bf16.msra.mxu0 %v1576_v45 }
 0x33b   : > { %v793_v12 = vpop.xlane.xlu1 %792 }
 0x33c   : > { %1669 = vrcp.f32 %v793_v12 }
 0x33d   : > { %1671 = vrcp.f32 %v790_v11 }
 0x33e   : > { %1673 = vrcp.f32 %v796_v14 }
 0x33f   : > { %1675 = vrcp.f32 %v1748_v10 }
 0x340   : > { %v859_v13 = vpop.f32.mrf.mxu1 }
 0x342   : > { %v1670_v16 = vpop.eup %1669 }
 0x343   : > { %v811_v17 = vmul.f32 %v1670_v16, %v1662_v53  ;;  %v1672_v18 = vpop.eup %1671 }
 0x344   : > { %v810_v27 = vmul.f32 %v1672_v18, %v1658_v41  ;;  %v1674_v22 = vpop.eup %1673 }
 0x345   : > { %v819_v19 = vpack.c.bf16 %v811_v17, %v811_v17  ;;  %v812_v23 = vmul.f32 %v1674_v22, %v1660_v47  ;;  %v1676_v11 = vpop.eup %1675 }
 0x346   : > { %v818_v42 = vpack.c.bf16 %v810_v27, %v810_v27  ;;  %v1066_v12 = vmul.f32 32.0, %v1676_v11  ;;  %vm1070_vm6 = vweird.f32 %v1676_v11 }
 0x347   : > { %1507 = vmatmul.msk.bf16.vlgmr.msrb.gmra.mxu2 %vm463_vm2, %v819_v19  ;;  %v820_v26 = vpack.c.bf16 %v812_v23, %v812_v23  ;;  %v1579_v23 = vld [vmem:[%s1834_s25 + $0x8] sm:$0xff] }
 0x348   : > { %v861_v20 = vpop.f32.mrf.mxu1 }
 0x349   : > { %v927_v61 = vpop.permute.xlu0 %926 }
 0x34a   : > { %v932_v21 = vsel %vm476_vm1, %v927_v61, 0 }
 0x34b   : > { %941 = vmatpush.bf16.msra.mxu1 %v932_v21 }
 0x34e   : > { %1506 = vmatmul.msk.bf16.vlgmr.msra.gmra.mxu1 %vm463_vm2, %v818_v42 }
 0x34f   : > { %1143 = vmatpush.bf16.msrb.mxu1 %v1579_v23 }
 0x353   : > { %v969_v24 = vpop.permute.xlu1 %968 }
 0x354   : > { %v974_v25 = vsel %vm476_vm1, %v969_v24, 0 }
 0x355   : > { %983 = vmatpush.bf16.msrb.mxu3 %v974_v25 }
 0x358   : > { %1508 = vmatmul.msk.bf16.vlgmr.msrb.gmra.mxu3 %vm463_vm2, %v820_v26  ;;  %v1578_v26 = vld [vmem:[%s1834_s25] sm:$0xff] }
 0x359   : > { %1144 = vmatpush.bf16.msrb.mxu1 %v1578_v26 }
 0x38d   : > { %v880_v28 = vpop.f32.mrf.mxu2 }
 0x395   : > { %v882_v29 = vpop.f32.mrf.mxu2 }
 0x396   : > { %v1587_v29 = vld [vmem:[%s1839_s29 + $0x38] sm:$0xff] }
 0x397   : > { %1219 = vmatpush.bf16.msra.mxu2 %v1587_v29 }
 0x3a7   : > { %v901_v30 = vpop.f32.mrf.mxu3 }
 0x3a8   : > { %v1628_v31 = vpack.i.bf16 %v901_v30, %v880_v28 }
 0x3aa   : > { %1629 = vrot.lane.b32.xlu0 %v1628_v31, %s1745_s19 }
 0x3af   : > { %v903_v32 = vpop.f32.mrf.mxu3 }
 0x3b0   : > { %v922_v33 = vpop.f32.mrf.mxu0  ;;  %v1586_v32 = vld [vmem:[%s1839_s29 + $0x30] sm:$0xff] }
 0x3b1   : > { %1220 = vmatpush.bf16.msra.mxu2 %v1586_v32 }
 0x3b8   : > { %v924_v34 = vpop.f32.mrf.mxu0 }
 0x3ca   : > { %v964_v35 = vpop.f32.mrf.mxu2 }
 0x3cb   : > { %v943_v36 = vpop.f32.mrf.mxu1 }
 0x3cc   : > { %v1633_v37 = vpack.i.bf16 %v943_v36, %v922_v33  ;;  %v1585_v36 = vld [vmem:[%s1839_s29 + $0x28] sm:$0xff] }
 0x3cd   : > { %1221 = vmatpush.bf16.msra.mxu2 %v1585_v36 }
 0x3ce   : > { %1634 = vrot.lane.b32.xlu1 %v1633_v37, %s1746_s26 }
 0x3d2   : > { %v966_v38 = vpop.f32.mrf.mxu2 }
 0x3d3   : > { %v945_v39 = vpop.f32.mrf.mxu1 }
 0x3d4   : > { %v1584_v39 = vld [vmem:[%s1839_s29 + $0x20] sm:$0xff] }
 0x3d5   : > { %1222 = vmatpush.bf16.msra.mxu2 %v1584_v39 }
 0x3db   : > { %v985_v40 = vpop.f32.mrf.mxu3 }
 0x3dc   : > { %v1638_v41 = vpack.i.bf16 %v985_v40, %v964_v35 }
 0x3de   : > { %1639 = vrot.lane.b32.xlu2 %v1638_v41, %s1747_s27 }
 0x3e3   : > { %v987_v43 = vpop.f32.mrf.mxu3 }
 0x41c   : > { %v1630_v46 = vpop.permute.xlu0 %1629 }
 0x41d   : > { %v1632_v47 = vunpack.i.h.bf16 %v1630_v46  ;;  %v1631_v48 = vunpack.i.l.bf16 %v1630_v46 }
 0x41f   : > { %v1013_v54 = vsel %vm463_vm2, %v1959_v63, %v1631_v48  ;;  %v1014_v55 = vsel %vm463_vm2, %v859_v13, %v1632_v47  ;;  %v1067_v13 = vsub.f32 1.0, %v1066_v12 }
 0x421   : > { %v1068_v14 = vmul.f32 %v1676_v11, %v1067_v13 }
 0x423   : > { %v1069_v16 = vadd.f32 %v1676_v11, %v1068_v14 }
 0x438   : > { %v1640_v49 = vpop.permute.xlu2 %1639 }
 0x439   : > { %v1642_v57 = vunpack.i.h.bf16 %v1640_v49  ;;  %v1641_v58 = vunpack.i.l.bf16 %v1640_v49  ;;  %v1110_v49 = vperm.slane %v1870_v15, 2 }
 0x440   : > { %v1635_v50 = vpop.permute.xlu1 %1634 }
 0x441   : > { %v1637_v52 = vunpack.i.h.bf16 %v1635_v50  ;;  %v1636_v53 = vunpack.i.l.bf16 %v1635_v50 }
 0x443   : > { %v1017_v59 = vsel %vm1015_vm3, %v1014_v55, %v1637_v52  ;;  %v1016_v60 = vsel %vm1015_vm3, %v1013_v54, %v1636_v53  ;;  %v1113_v54 = vperm.slane %v1870_v15, 3 }
 0x444   : > { %v1020_v62 = vsel %vm1018_vm4, %v1017_v59, %v1642_v57  ;;  %v1019_v0 = vsel %vm1018_vm4, %v1016_v60, %v1641_v58 }
 0x445   : > { %v1021_v1 = vpack.c.bf16 %v1020_v62, %v1019_v0  ;;  %v1583_v0 = vld [vmem:[%s1839_s29 + $0x18] sm:$0xff] }
 0x446   : > { %1223 = vmatpush.bf16.msra.mxu2 %v1583_v0 }
 0x447   : > { %1517 = vmatmul.msk.bf16.vlgmr.msra.gmra.mxu0 %vm1039_vm5, %v1021_v1  ;;  %v1582_v1 = vld [vmem:[%s1839_s29 + $0x10] sm:$0xff] }
 0x44a   : > { %1224 = vmatpush.bf16.msra.mxu2 %v1582_v1 }
 0x4c4   : > { %v1052_v3 = vpop.f32.mrf.mxu0 }
 0x4c5   : > { %v1053_v4 = vadd.f32 %v1052_v3, %v1026_v51  ;;  %v1580_v3 = vld [vmem:[%s1839_s29] sm:$0xff] }
 0x4c7   : > { %v1057_v56 = vadd.f32 %v1053_v4, %v1856_v6  ;;  %v1980_v6 = vsel %vm1070_vm6, %v1676_v11, %v1069_v16  ;;  %v1170_v11 = vperm.slane %v1870_v15, 5 }
 0x4c9   : > { %v1059_v63 = vsel %vm1039_vm5, %v1057_v56, 0.0 }
 0x4ca   : > { %1060 = vadd.xlane.f32.xlu0 %v1059_v63 }
 0x4cc   : > { %v1054_v2 = vpop.f32.mrf.mxu0 }
 0x4cd   : > { %v1055_v5 = vadd.f32 %v1054_v2, %v1026_v51  ;;  %v1581_v51 = vld [vmem:[%s1839_s29 + $0x8] sm:$0xff] }
 0x4ce   : > { %1225 = vmatpush.bf16.msra.mxu2 %v1581_v51 }
 0x4cf   : > { %v1058_v8 = vadd.f32 %v1055_v5, %v1858_v7 }
 0x4d1   : > { %v1062_v9 = vsel %vm1039_vm5, %v1058_v8, 0.0 }
 0x4d2   : > { %1063 = vadd.xlane.f32.xlu1 %v1062_v9  ;;  %1226 = vmatpush.bf16.msra.mxu2 %v1580_v3 }
 0x53d   : > { %v1061_v17 = vpop.xlane.xlu0 %1060 }
 0x53e   : > { %v1072_v18 = vmul.f32 %v1980_v6, %v1061_v17 }
 0x540   : > { %v1074_v19 = vsub.f32 %v1057_v56, %v1072_v18  ;;  %v1121_v56 = vperm.slane %v1870_v15, 4 }
 0x542   : > { %v1076_v7 = vmul.f32 %v1074_v19, %v1074_v19 }
 0x544   : > { %v1078_v27 = vsel %vm1039_vm5, %v1076_v7, 0.0 }
 0x545   : > { %v1064_v20 = vpop.xlane.xlu1 %1063  ;;  %1079 = vadd.xlane.f32.xlu2 %v1078_v27 }
 0x546   : > { %v1073_v61 = vmul.f32 %v1980_v6, %v1064_v20 }
 0x548   : > { %v1075_v21 = vsub.f32 %v1058_v8, %v1073_v61 }
 0x54a   : > { %v1077_v42 = vmul.f32 %v1075_v21, %v1075_v21 }
 0x54c   : > { %v1081_v22 = vsel %vm1039_vm5, %v1077_v42, 0.0 }
 0x54d   : > { %1082 = vadd.xlane.f32.xlu0 %v1081_v22 }
 0x5b8   : > { %v1080_v24 = vpop.xlane.xlu2 %1079 }
 0x5b9   : > { %v1084_v25 = vmul.f32 %v1080_v24, %v1980_v6 }
 0x5bb   : > { %v1086_v28 = vadd.f32 1e-05, %v1084_v25 }
 0x5bd   : > { %1677 = vrsqrt.f32 %v1086_v28  ;;  %vm1094_vm8 = vweird.f32 %v1086_v28 }
 0x5c0   : > { %v1083_v30 = vpop.xlane.xlu0 %1082 }
 0x5c1   : > { %v1085_v31 = vmul.f32 %v1083_v30, %v1980_v6 }
 0x5c3   : > { %v1678_v33 = vpop.eup %1677  ;;  %v1087_v34 = vadd.f32 1e-05, %v1085_v31 }
 0x5c4   : > { %v1089_v35 = vmul.f32 %v1678_v33, %v1086_v28  ;;  %vm1095_vm7 = vweird.f32 %v1678_v33 }
 0x5c5   : > { %1679 = vrsqrt.f32 %v1087_v34  ;;  %vm1096_vm9 = vmor %vm1094_vm8, %vm1095_vm7  ;;  %vm1104_vm11 = vweird.f32 %v1087_v34 }
 0x5c6   : > { %v1090_v37 = vmul.f32 %v1678_v33, %v1089_v35 }
 0x5c8   : > { %v1091_v38 = vmul.f32 0.5, %v1090_v37 }
 0x5ca   : > { %v1092_v40 = vsub.f32 1.5, %v1091_v38 }
 0x5cb   : > { %v1680_v41 = vpop.eup %1679 }
 0x5cc   : > { %v1093_v43 = vmul.f32 %v1678_v33, %v1092_v40  ;;  %v1099_v44 = vmul.f32 %v1680_v41, %v1087_v34  ;;  %vm1105_vm10 = vweird.f32 %v1680_v41 }
 0x5cd   : > { %vm1106_vm12 = vmor %vm1104_vm11, %vm1105_vm10 }
 0x5ce   : > { %v1100_v45 = vmul.f32 %v1680_v41, %v1099_v44  ;;  %v1097_v46 = vsel %vm1096_vm9, %v1678_v33, %v1093_v43  ;;  %v1279_v43 = vperm.slane %v1870_v15, 6 }
 0x5cf   : > { %v1108_v50 = vmul.f32 %v1097_v46, %v1074_v19  ;;  %v1282_v46 = vperm.slane %v1870_v15, 7 }
 0x5d0   : > { %v1101_v47 = vmul.f32 0.5, %v1100_v45 }
 0x5d1   : > { %v1111_v55 = vmul.f32 %v1110_v49, %v1108_v50 }
 0x5d2   : > { %v1102_v48 = vsub.f32 1.5, %v1101_v47 }
 0x5d3   : > { %v1114_v59 = vadd.f32 %v1113_v54, %v1111_v55 }
 0x5d4   : > { %v1103_v52 = vmul.f32 %v1680_v41, %v1102_v48 }
 0x5d6   : > { %v1107_v53 = vsel %vm1106_vm12, %v1680_v41, %v1103_v52 }
 0x5d7   : > { %v1109_v57 = vmul.f32 %v1107_v53, %v1075_v21 }
 0x5d9   : > { %v1112_v58 = vmul.f32 %v1110_v49, %v1109_v57 }
 0x5db   : > { %v1115_v60 = vadd.f32 %v1113_v54, %v1112_v58 }
 0x5dd   : > { %v1116_v62 = vpack.c.bf16 %v1115_v60, %v1114_v59 }
 0x5df   : > { %1526 = vmatmul.msk.bf16.vlgmr.msrb.gmra.mxu1 %vm1039_vm5, %v1116_v62 }
 0x65c   : > { %v1146_v4 = vpop.f32.mrf.mxu1 }
 0x65d   : > { %v1147_v63 = vadd.f32 %v1146_v4, %v1121_v56 }
 0x65f   : > { %v1151_v8 = vmax.f32 %v1147_v63, 0.0 }
 0x664   : > { %v1148_v2 = vpop.f32.mrf.mxu1 }
 0x665   : > { %v1149_v5 = vadd.f32 %v1148_v2, %v1121_v56 }
 0x667   : > { %v1152_v9 = vmax.f32 %v1149_v5, 0.0 }
 0x669   : > { %v1153_v10 = vpack.c.bf16 %v1152_v9, %v1151_v8 }
 0x66b   : > { %1227 = vmatmul.bf16.vlgmr.msra.gmra.mxu2 %v1153_v10 }
 0x6ee   : > { %v1228_v12 = vpop.f32.mrf.mxu2 }
 0x6ef   : > { %v1229_v13 = vadd.f32 %v1228_v12, %v1170_v11 }
 0x6f1   : > { %v1233_v14 = vadd.f32 %v1229_v13, %v1114_v59 }
 0x6f3   : > { %v1235_v16 = vsel %vm1039_vm5, %v1233_v14, 0.0 }
 0x6f4   : > { %1236 = vadd.xlane.f32.xlu1 %v1235_v16 }
 0x6f6   : > { %v1230_v17 = vpop.f32.mrf.mxu2 }
 0x6f7   : > { %v1231_v18 = vadd.f32 %v1230_v17, %v1170_v11 }
 0x6f9   : > { %v1234_v19 = vadd.f32 %v1231_v18, %v1115_v60 }
 0x6fb   : > { %v1238_v7 = vsel %vm1039_vm5, %v1234_v19, 0.0 }
 0x6fc   : > { %1239 = vadd.xlane.f32.xlu2 %v1238_v7 }
 0x767   : > { %v1237_v27 = vpop.xlane.xlu1 %1236 }
 0x768   : > { %v1241_v20 = vmul.f32 %v1237_v27, %v1980_v6 }
 0x76a   : > { %v1243_v61 = vsub.f32 %v1233_v14, %v1241_v20 }
 0x76c   : > { %v1245_v21 = vmul.f32 %v1243_v61, %v1243_v61 }
 0x76e   : > { %v1247_v42 = vsel %vm1039_vm5, %v1245_v21, 0.0 }
 0x76f   : > { %v1240_v22 = vpop.xlane.xlu2 %1239  ;;  %1248 = vadd.xlane.f32.xlu0 %v1247_v42 }
 0x770   : > { %v1242_v23 = vmul.f32 %v1240_v22, %v1980_v6 }
 0x772   : > { %v1244_v24 = vsub.f32 %v1234_v19, %v1242_v23 }
 0x774   : > { %v1246_v25 = vmul.f32 %v1244_v24, %v1244_v24 }
 0x776   : > { %v1250_v26 = vsel %vm1039_vm5, %v1246_v25, 0.0 }
 0x777   : > { %1251 = vadd.xlane.f32.xlu1 %v1250_v26 }
 0x7e2   : > { %v1249_v28 = vpop.xlane.xlu0 %1248 }
 0x7e3   : > { %v1253_v29 = vmul.f32 %v1249_v28, %v1980_v6 }
 0x7e5   : > { %v1255_v30 = vadd.f32 1e-05, %v1253_v29 }
 0x7e7   : > { %1681 = vrsqrt.f32 %v1255_v30  ;;  %vm1263_vm14 = vweird.f32 %v1255_v30 }
 0x7ea   : > { %v1252_v31 = vpop.xlane.xlu1 %1251 }
 0x7eb   : > { %v1254_v32 = vmul.f32 %v1252_v31, %v1980_v6 }
 0x7ed   : > { %v1682_v33 = vpop.eup %1681  ;;  %v1256_v34 = vadd.f32 1e-05, %v1254_v32 }
 0x7ee   : > { %v1258_v35 = vmul.f32 %v1682_v33, %v1255_v30  ;;  %vm1264_vm13 = vweird.f32 %v1682_v33 }
 0x7ef   : > { %1683 = vrsqrt.f32 %v1256_v34  ;;  %vm1265_vm15 = vmor %vm1263_vm14, %vm1264_vm13  ;;  %vm1273_vm1 = vweird.f32 %v1256_v34 }
 0x7f0   : > { %v1259_v36 = vmul.f32 %v1682_v33, %v1258_v35 }
 0x7f2   : > { %v1260_v37 = vmul.f32 0.5, %v1259_v36 }
 0x7f4   : > { %v1261_v38 = vsub.f32 1.5, %v1260_v37 }
 0x7f5   : > { %v1684_v39 = vpop.eup %1683 }
 0x7f6   : > { %v1262_v40 = vmul.f32 %v1682_v33, %v1261_v38  ;;  %v1268_v41 = vmul.f32 %v1684_v39, %v1256_v34  ;;  %vm1274_vm0 = vweird.f32 %v1684_v39 }
 0x7f7   : > { %vm1275_vm2 = vmor %vm1273_vm1, %vm1274_vm0 }
 0x7f8   : > { %v1266_v44 = vsel %vm1265_vm15, %v1682_v33, %v1262_v40  ;;  %v1269_v45 = vmul.f32 %v1684_v39, %v1268_v41 }
 0x7f9   : > { %v1277_v6 = vmul.f32 %v1266_v44, %v1243_v61 }
 0x7fa   : > { %v1270_v47 = vmul.f32 0.5, %v1269_v45 }
 0x7fb   : > { %v1280_v48 = vmul.f32 %v1279_v43, %v1277_v6 }
 0x7fc   : > { %v1271_v49 = vsub.f32 1.5, %v1270_v47 }
 0x7fd   : > { %v1283_v50 = vadd.f32 %v1282_v46, %v1280_v48 }
 0x7fe   : > { %v1272_v52 = vmul.f32 %v1684_v39, %v1271_v49 }
 0x7ff   : > { %1285 = vst.msk [vmem:[#allocation2] sm:$0xff] %vm1039_vm5, %v1283_v50 }
 0x800   : > { %v1276_v53 = vsel %vm1275_vm2, %v1684_v39, %v1272_v52 }
 0x801   : > { %v1278_v54 = vmul.f32 %v1276_v53, %v1244_v24 }
 0x803   : > { %v1281_v55 = vmul.f32 %v1279_v43, %v1278_v54  ;;  %1290 = sbr.rel (%p1559_p6) target bundleno = 2210 (0x8a2), region = 64 }
 0x805   : > { %v1284_v57 = vadd.f32 %v1282_v46, %v1281_v55 }
 0x807   : > { %1286 = vst.msk [vmem:[#allocation2 + $0x8] sm:$0xff] %vm1039_vm5, %v1284_v57 }
 0x808   : > { %v1589_v15 = vld [vmem:[%s2049_s7 + $0x8] sm:$0xff]  ;;  %v1291_v58 = vsel %vm1039_vm5, %v1283_v50, -inf  ;;  %v1298_v59 = vsel %vm1039_vm5, %v1284_v57, -inf  ;;  %v1588_v0 = vld [vmem:[%s2049_s7] sm:$0xff]  ;;  %vm1319_vm3 = vcmask 1041409  }
 0x809   : > { %v1292_v60 = vrot.slane %v1291_v58, 4  ;;  %v1299_v62 = vrot.slane %v1298_v59, 4  ;;  %1343 = vmatpush.bf16.msra.mxu0 %v1589_v15  ;;  %v1685_v17 = vld [vmem:[%s2050_s8] ss:$0 sm:$0xff] }
 0x80b   : > { %v1293_v1 = vmax.f32 %v1291_v58, %v1292_v60  ;;  %v1300_v51 = vmax.f32 %v1298_v59, %v1299_v62 }
 0x80d   : > { %v1294_v3 = vrot.slane %v1293_v1, 2  ;;  %v1301_v4 = vrot.slane %v1300_v51, 2  ;;  %1344 = vmatpush.bf16.msra.mxu0 %v1588_v0 }
 0x80f   : > { %v1295_v56 = vmax.f32 %v1293_v1, %v1294_v3  ;;  %v1302_v63 = vmax.f32 %v1300_v51, %v1301_v4 }
 0x811   : > { %v1296_v2 = vrot.slane %v1295_v56, 1  ;;  %v1303_v5 = vrot.slane %v1302_v63, 1 }
 0x813   : > { %v1297_v8 = vmax.f32 %v1295_v56, %v1296_v2  ;;  %v1304_v9 = vmax.f32 %v1302_v63, %v1303_v5 }
 0x815   : > { %v1305_v10 = vpack.c.bf16 %v1297_v8, %v1297_v8  ;;  %v1306_v11 = vpack.c.bf16 %v1304_v9, %v1304_v9 }
 0x817   : > { %v1317_v12 = vunpack.c.l.b16 %v1305_v10  ;;  %v1318_v13 = vunpack.c.l.b16 %v1306_v11 }
 0x819   : > { %v1320_v14 = vsel %vm1319_vm3, %v1318_v13, %v1317_v12 }
 0x81a   : > { %v1321_v16 = vpack.c.b16 %v1320_v14, %v1320_v14 }
 0x81c   : > { %1568 = vmatmul.msk.bf16.vlgmr.msra.gmra.mxu0 %vm1039_vm5, %v1321_v16 }
 0x899   : > { %v1346_v18 = vpop.f32.mrf.mxu0 }
 0x89a   : > { %v1347_v19 = vadd.f32 %v1685_v17, %v1346_v18 }
 0x89c   : > { %1350 = vst [vmem:[#allocation3] sm:$0x3] %v1347_v19 }
 0x8a1   : > { %v1348_v7 = vpop.f32.mrf.mxu0 }
 0x8a2 PF: > { %s2053_s15 = sadd.s32 4294967295, %s1740_s11   ;;  %s1361_s16 = sshll.u32 %s2051_s9, 4  ;;  %s1362_s16 = int_to_ptr.hbm [resolvable:$true] %s1361_s16 }
 0x8a3   : > { %p1594_p7 = scmp.eq.s32.totalorder %s2053_s15, 1  ;;  %s1749_s21 = smov [#allocation3]  }
 0x8a4   : > { %s1359_s23 = sshll.u32 %s1749_s21, 4  ;;  %s1360_s23 = int_to_ptr.vmem [resolvable:$true] %s1359_s23 }
 0x8a5   : > { %1591 = dma.vmem_to_hbm [thread:$0]  (%p1594_p7), %s1360_s23, 32, %s1362_s16, [#allocation4]  }
 0x8a6   : > { %1727 = dma.done.wait (%p1594_p7), [#allocation4], 32  }
 0x8a7   : > { %1729 = vsyncadd (%p1594_p7), [#allocation4], 4294967264 }
 0x8a8 PF: > { %s20_s11 = sadd.s32 1, %s1740_s11   ;;  %s2054_s24 = sld [smem:[#allocation6_spill]] }
 0x8a9   : > { %p17_p8 = scmp.ge.s32.totalorder %s20_s11, 4   ;;  %s2055_s30 = smov %s1736_s10 }
 0x8ab   :  { %19 = sbr.rel (!%p17_p8) target bundleno = 2 (0x2), region = 107 }
 0x8ae   : > { %s2056_s10 = smov %s2054_s24 }
 0x8b0   :  { %1375 = vsyncpa [#allocation4], 1 }
 0x8b1   :  { %1377 = vsyncpa [#allocation4 + $0x1], 1 }

</bundles_post_ra>
